<compile_context>
chip_gen: v7x
topology: tpu7x:2x2x1
jax: 0.10.0
libtpu: 0.0.40
codegen_flags: <defaults>
</compile_context>

<pallas_src>
import functools

import jax
import jax.numpy as jnp
from jax.experimental import pallas as pl
from jax.experimental.pallas import tpu as pltpu


# ---------------------------------------------------------------------------
# Fused kernel: conv1+BN1+ReLU -> (conv2+BN2) + (downsample+BNdown) -> add+ReLU
# ---------------------------------------------------------------------------
def _release_block_kernel(x_ref, w1_ref, b1_ref, wcat_ref, bcat_ref, o_ref,
                          *, Nb, H, W, Cin, Cout, KH, KW, KW1, use_bf16_mxu):
    Ho = H - KH + 1
    Wo = W - KW + 1

    xv = x_ref[...]                                       # (Nb, H, W, Cin), f32

    # conv1 padding (0, 1) along W, built in-register (no wrapper-side pad).
    zcol = jnp.zeros((Nb, H, 1, Cin), jnp.float32)
    xp = jnp.concatenate([zcol, xv, zcol], axis=2)        # (Nb, H, W+2, Cin)

    # ---- conv1 + BN1 (folded) + ReLU : one im2col matmul --------------------
    taps1 = [xp[:, :, kw:kw + W, :].reshape(Nb * H * W, Cin) for kw in range(KW1)]
    patch1 = jnp.concatenate(taps1, axis=1)               # (Nb*H*W, KW1*Cin)
    if use_bf16_mxu:
        patch1 = patch1.astype(jnp.bfloat16)
    h1 = jnp.dot(patch1, w1_ref[...], preferred_element_type=jnp.float32)
    h1 = jnp.maximum(h1 + b1_ref[...], 0.0)               # BN1 shift + ReLU (f32)
    h1 = h1.reshape(Nb, H, W, Cout)

    # ---- conv2+BN2 and downsample+BNdown merged along the contraction dim ---
    taps2 = []
    for kh in range(KH):                                  # conv2 path (input h1)
        for kw in range(KW):
            taps2.append(h1[:, kh:kh + Ho, kw:kw + Wo, :].reshape(Nb * Ho * Wo, Cout))
    for kh in range(KH):                                  # downsample path (input x)
        for kw in range(KW):
            taps2.append(xv[:, kh:kh + Ho, kw:kw + Wo, :].reshape(Nb * Ho * Wo, Cin))
    patch2 = jnp.concatenate(taps2, axis=1)               # (Nb*Ho*Wo, KH*KW*(Cout+Cin))
    if use_bf16_mxu:
        patch2 = patch2.astype(jnp.bfloat16)
    out = jnp.dot(patch2, wcat_ref[...], preferred_element_type=jnp.float32)
    out = jnp.maximum(out + bcat_ref[...], 0.0)           # fused bias + final ReLU
    o_ref[...] = out.reshape(Nb, Ho, Wo, Cout)


# ---------------------------------------------------------------------------
# Batch-block heuristic
# ---------------------------------------------------------------------------
def _pick_batch_block(N, H, W, target_rows=256):
    """Largest divisor Nb of N with Nb*H*W <= target_rows, preferring to keep
    at least 2 grid steps (so v7x's two TensorCores both get work)."""
    divisors = [nb for nb in range(1, N + 1) if N % nb == 0]
    multi_step = [nb for nb in divisors if N // nb >= 2]
    pool = multi_step if multi_step else divisors
    fitting = [nb for nb in pool if nb * H * W <= target_rows]
    return max(fitting) if fitting else min(pool)


# ---------------------------------------------------------------------------
# Wrapper
# ---------------------------------------------------------------------------
def release_block_forward(x_nchw, params, kernel_size, eps=1e-5,
                          use_bf16_mxu=False, batch_block=None):
    KH, KW = kernel_size
    N, Cin, H, W = x_nchw.shape
    Cout, _, _, KW1 = params["w1"].shape
    Ho, Wo = H - KH + 1, W - KW + 1
    assert Ho >= 1 and Wo >= 1, f"kernel_size {kernel_size} too large for input {H}x{W}"

    Nb = _pick_batch_block(N, H, W) if batch_block is None else batch_block
    assert N % Nb == 0, (N, Nb)

    x = jnp.transpose(x_nchw, (0, 2, 3, 1)).astype(jnp.float32)     # NHWC

    # Fold BN (eval mode) into per-channel scale/shift; fold scale into weights.
    # TODO(synk): training-mode BN (batch-stat computation + running-stat update)
    # is not implemented; this is the eval-mode forward.
    def fold_bn(gamma, beta, mean, var):
        scale = gamma / jnp.sqrt(var + eps)
        shift = beta - mean * scale
        return scale, shift

    s1, b1 = fold_bn(*params["bn1"])
    s2, b2 = fold_bn(*params["bn2"])
    sd, bd = fold_bn(*params["bnd"])

    # conv1 weight (Cout, Cin, 1, KW1) -> im2col (KW1*Cin, Cout), BN1 scale folded.
    w1m = (jnp.transpose(params["w1"][:, :, 0, :], (2, 1, 0)) * s1).reshape(KW1 * Cin, Cout)
    b1v = b1.reshape(1, Cout)

    # conv2 (Cout, Cout, KH, KW) & downsample (Cout, Cin, KH, KW) -> im2col,
    # BN scales folded, stacked along the contraction dim (conv2 taps first).
    w2m = (jnp.transpose(params["w2"], (2, 3, 1, 0)) * s2).reshape(KH * KW * Cout, Cout)
    wdm = (jnp.transpose(params["wd"], (2, 3, 1, 0)) * sd).reshape(KH * KW * Cin, Cout)
    wcat = jnp.concatenate([w2m, wdm], axis=0)             # (KH*KW*(Cout+Cin), Cout)
    bcat = (b2 + bd).reshape(1, Cout)

    if use_bf16_mxu:
        # bf16 MXU inputs (2x throughput on v6e/v7x); elementwise math stays f32.
        w1m = w1m.astype(jnp.bfloat16)
        wcat = wcat.astype(jnp.bfloat16)

    kern = functools.partial(
        _release_block_kernel, Nb=Nb, H=H, W=W, Cin=Cin, Cout=Cout,
        KH=KH, KW=KW, KW1=KW1, use_bf16_mxu=use_bf16_mxu)

    out = pl.pallas_call(
        kern,
        out_shape=jax.ShapeDtypeStruct((N, Ho, Wo, Cout), jnp.float32),
        grid=(N // Nb,),
        in_specs=[
            pl.BlockSpec((Nb, H, W, Cin), lambda n: (n, 0, 0, 0)),
            pl.BlockSpec(w1m.shape, lambda n: (0, 0)),
            pl.BlockSpec((1, Cout), lambda n: (0, 0)),
            pl.BlockSpec(wcat.shape, lambda n: (0, 0)),
            pl.BlockSpec((1, Cout), lambda n: (0, 0)),
        ],
        out_specs=pl.BlockSpec((Nb, Ho, Wo, Cout), lambda n: (n, 0, 0, 0)),
        compiler_params=pltpu.CompilerParams(dimension_semantics=("parallel",)),
    )(x, w1m, b1v, wcat, bcat)

    return jnp.transpose(out, (0, 3, 1, 2))                 # back to NCHW


# ---------------------------------------------------------------------------
# Pure-JAX reference (NCHW, matches PyTorch eval-mode forward)
# ---------------------------------------------------------------------------
def reference_forward(x, params, kernel_size, eps=1e-5):
    def conv(inp, w, padding):
        return jax.lax.conv_general_dilated(
            inp, w, (1, 1), padding, dimension_numbers=("NCHW", "OIHW", "NCHW"))

    def bn(inp, gamma, beta, mean, var):
        g = gamma[None, :, None, None]
        b = beta[None, :, None, None]
        m = mean[None, :, None, None]
        v = var[None, :, None, None]
        return (inp - m) / jnp.sqrt(v + eps) * g + b

    out = conv(x, params["w1"], ((0, 0), (1, 1)))
    out = jnp.maximum(bn(out, *params["bn1"]), 0.0)
    out = bn(conv(out, params["w2"], ((0, 0), (0, 0))), *params["bn2"])
    res = bn(conv(x, params["wd"], ((0, 0), (0, 0))), *params["bnd"])
    return jnp.maximum(out + res, 0.0)


if __name__ == "__main__":
    # Small shapes consistent with the module (text features: H = 1).
    N, Cin, Cout, H, W = 2, 8, 8, 1, 16
    kernel_size = (1, 3)
    KH, KW = kernel_size

    key = jax.random.PRNGKey(0)
    k1, k2, k3, kx = jax.random.split(key, 4)

    # Conv weights ~ N(0, 0.01) per _init_weight; BN with deterministic running stats.
    def bn_params(c, offset):
        idx = jnp.arange(c, dtype=jnp.float32)
        gamma = 1.0 + 0.05 * idx
        beta = 0.01 * idx + offset
        mean = 0.02 * idx - offset
        var = 1.0 + 0.1 * idx
        return (gamma, beta, mean, var)

    params = {
        "w1": 0.01 * jax.random.normal(k1, (Cout, Cin, 1, 3), jnp.float32),
        "w2": 0.01 * jax.random.normal(k2, (Cout, Cout, KH, KW), jnp.float32),
        "wd": 0.01 * jax.random.normal(k3, (Cout, Cin, KH, KW), jnp.float32),
        "bn1": bn_params(Cout, 0.1),
        "bn2": bn_params(Cout, 0.2),
        "bnd": bn_params(Cout, 0.3),
    }

    x = jax.random.normal(kx, (N, Cin, H, W), jnp.float32)

    out = jax.block_until_ready(release_block_forward(x, params, kernel_size))
    ref = jax.block_until_ready(reference_forward(x, params, kernel_size))

    assert out.shape == (N, Cout, H - KH + 1, W - KW + 1), out.shape
    assert jnp.allclose(out, ref, atol=1e-4, rtol=1e-4), float(jnp.max(jnp.abs(out - ref)))

    print("KERNEL_OK")
</pallas_src>

<mosaic_0001>
module attributes {stable_mosaic.version = 11 : i64} {
  func.func @_release_block_kernel(%arg0: i32, %arg1: memref<1x1x16x8xf32, #tpu.memory_space<vmem>>, %arg2: memref<24x8xf32, #tpu.memory_space<vmem>>, %arg3: memref<1x8xf32, #tpu.memory_space<vmem>>, %arg4: memref<48x8xf32, #tpu.memory_space<vmem>>, %arg5: memref<1x8xf32, #tpu.memory_space<vmem>>, %arg6: memref<1x1x14x8xf32, #tpu.memory_space<vmem>>) attributes {dimension_semantics = [#tpu.dimension_semantics<parallel>], iteration_bounds = array<i64: 2>, scalar_prefetch = 0 : i64, scratch_operands = 0 : i64, tpu.core_type = #tpu.core_type<tc>, window_params = [{transform_indices = @transform_0, window_bounds = array<i64: 1, 1, 16, 8>}, {pipeline_mode = #tpu.pipeline_mode<synchronous>, transform_indices = @transform_1, window_bounds = array<i64: 24, 8>}, {pipeline_mode = #tpu.pipeline_mode<synchronous>, transform_indices = @transform_2, window_bounds = array<i64: 1, 8>}, {pipeline_mode = #tpu.pipeline_mode<synchronous>, transform_indices = @transform_3, window_bounds = array<i64: 48, 8>}, {pipeline_mode = #tpu.pipeline_mode<synchronous>, transform_indices = @transform_4, window_bounds = array<i64: 1, 8>}, {transform_indices = @transform_5, window_bounds = array<i64: 1, 1, 14, 8>}]} {
    %c0 = arith.constant 0 : index
    %c0_0 = arith.constant 0 : index
    %c0_1 = arith.constant 0 : index
    %c0_2 = arith.constant 0 : index
    %0 = vector.load %arg1[%c0, %c0_0, %c0_1, %c0_2] : memref<1x1x16x8xf32, #tpu.memory_space<vmem>>, vector<1x1x16x8xf32>
    %cst = arith.constant 0.000000e+00 : f32
    %1 = vector.broadcast %cst : f32 to vector<1x1x1x8xf32>
    %2 = tpu.concatenate %1, %0, %1 in 2 : vector<1x1x1x8xf32>, vector<1x1x16x8xf32>, vector<1x1x1x8xf32> -> vector<1x1x18x8xf32>
    %3 = vector.extract_strided_slice %2 {offsets = [0, 0, 0, 0], sizes = [1, 1, 16, 8], strides = [1, 1, 1, 1]} : vector<1x1x18x8xf32> to vector<1x1x16x8xf32>
    %4 = vector.shape_cast %3 : vector<1x1x16x8xf32> to vector<16x8xf32>
    %5 = vector.extract_strided_slice %2 {offsets = [0, 0, 1, 0], sizes = [1, 1, 16, 8], strides = [1, 1, 1, 1]} : vector<1x1x18x8xf32> to vector<1x1x16x8xf32>
    %6 = vector.shape_cast %5 : vector<1x1x16x8xf32> to vector<16x8xf32>
    %7 = vector.extract_strided_slice %2 {offsets = [0, 0, 2, 0], sizes = [1, 1, 16, 8], strides = [1, 1, 1, 1]} : vector<1x1x18x8xf32> to vector<1x1x16x8xf32>
    %8 = vector.shape_cast %7 : vector<1x1x16x8xf32> to vector<16x8xf32>
    %9 = tpu.concatenate %4, %6, %8 in 1 : vector<16x8xf32>, vector<16x8xf32>, vector<16x8xf32> -> vector<16x24xf32>
    %c0_3 = arith.constant 0 : index
    %c0_4 = arith.constant 0 : index
    %10 = vector.load %arg2[%c0_3, %c0_4] : memref<24x8xf32, #tpu.memory_space<vmem>>, vector<24x8xf32>
    %cst_5 = arith.constant dense<0.000000e+00> : vector<16x8xf32>
    %11 = tpu.matmul %9, %10, %cst_5 {dimension_numbers = #tpu.dot_dimension_numbers<[1], [0], [0], [1], [0, 0, 1, 1], [], []>} : vector<16x24xf32>, vector<24x8xf32>, vector<16x8xf32> -> vector<16x8xf32>
    %c0_6 = arith.constant 0 : index
    %c0_7 = arith.constant 0 : index
    %12 = vector.load %arg3[%c0_6, %c0_7] : memref<1x8xf32, #tpu.memory_space<vmem>>, vector<1x8xf32>
    %13 = vector.broadcast %12 : vector<1x8xf32> to vector<16x8xf32>
    %14 = arith.addf %11, %13 : vector<16x8xf32>
    %cst_8 = arith.constant 0.000000e+00 : f32
    %15 = vector.broadcast %cst_8 : f32 to vector<16x8xf32>
    %16 = arith.maximumf %14, %15 : vector<16x8xf32>
    %17 = vector.shape_cast %16 : vector<16x8xf32> to vector<1x1x16x8xf32>
    %18 = vector.extract_strided_slice %17 {offsets = [0, 0, 0, 0], sizes = [1, 1, 14, 8], strides = [1, 1, 1, 1]} : vector<1x1x16x8xf32> to vector<1x1x14x8xf32>
    %19 = vector.shape_cast %18 : vector<1x1x14x8xf32> to vector<14x8xf32>
    %20 = vector.extract_strided_slice %17 {offsets = [0, 0, 1, 0], sizes = [1, 1, 14, 8], strides = [1, 1, 1, 1]} : vector<1x1x16x8xf32> to vector<1x1x14x8xf32>
    %21 = vector.shape_cast %20 : vector<1x1x14x8xf32> to vector<14x8xf32>
    %22 = vector.extract_strided_slice %17 {offsets = [0, 0, 2, 0], sizes = [1, 1, 14, 8], strides = [1, 1, 1, 1]} : vector<1x1x16x8xf32> to vector<1x1x14x8xf32>
    %23 = vector.shape_cast %22 : vector<1x1x14x8xf32> to vector<14x8xf32>
    %24 = vector.extract_strided_slice %0 {offsets = [0, 0, 0, 0], sizes = [1, 1, 14, 8], strides = [1, 1, 1, 1]} : vector<1x1x16x8xf32> to vector<1x1x14x8xf32>
    %25 = vector.shape_cast %24 : vector<1x1x14x8xf32> to vector<14x8xf32>
    %26 = vector.extract_strided_slice %0 {offsets = [0, 0, 1, 0], sizes = [1, 1, 14, 8], strides = [1, 1, 1, 1]} : vector<1x1x16x8xf32> to vector<1x1x14x8xf32>
    %27 = vector.shape_cast %26 : vector<1x1x14x8xf32> to vector<14x8xf32>
    %28 = vector.extract_strided_slice %0 {offsets = [0, 0, 2, 0], sizes = [1, 1, 14, 8], strides = [1, 1, 1, 1]} : vector<1x1x16x8xf32> to vector<1x1x14x8xf32>
    %29 = vector.shape_cast %28 : vector<1x1x14x8xf32> to vector<14x8xf32>
    %30 = tpu.concatenate %19, %21, %23, %25, %27, %29 in 1 : vector<14x8xf32>, vector<14x8xf32>, vector<14x8xf32>, vector<14x8xf32>, vector<14x8xf32>, vector<14x8xf32> -> vector<14x48xf32>
    %c0_9 = arith.constant 0 : index
    %c0_10 = arith.constant 0 : index
    %31 = vector.load %arg4[%c0_9, %c0_10] : memref<48x8xf32, #tpu.memory_space<vmem>>, vector<48x8xf32>
    %cst_11 = arith.constant dense<0.000000e+00> : vector<14x8xf32>
    %32 = tpu.matmul %30, %31, %cst_11 {dimension_numbers = #tpu.dot_dimension_numbers<[1], [0], [0], [1], [0, 0, 1, 1], [], []>} : vector<14x48xf32>, vector<48x8xf32>, vector<14x8xf32> -> vector<14x8xf32>
    %c0_12 = arith.constant 0 : index
    %c0_13 = arith.constant 0 : index
    %33 = vector.load %arg5[%c0_12, %c0_13] : memref<1x8xf32, #tpu.memory_space<vmem>>, vector<1x8xf32>
    %34 = vector.broadcast %33 : vector<1x8xf32> to vector<14x8xf32>
    %35 = arith.addf %32, %34 : vector<14x8xf32>
    %cst_14 = arith.constant 0.000000e+00 : f32
    %36 = vector.broadcast %cst_14 : f32 to vector<14x8xf32>
    %37 = arith.maximumf %35, %36 : vector<14x8xf32>
    %38 = vector.shape_cast %37 : vector<14x8xf32> to vector<1x1x14x8xf32>
    %c0_15 = arith.constant 0 : index
    %c0_16 = arith.constant 0 : index
    %c0_17 = arith.constant 0 : index
    %c0_18 = arith.constant 0 : index
    %39 = vector.load %arg6[%c0_15, %c0_16, %c0_17, %c0_18] : memref<1x1x14x8xf32, #tpu.memory_space<vmem>>, vector<1x1x14x8xf32>
    tpu.vector_store %arg6[%c0_15, %c0_16, %c0_17, %c0_18], %38 {strides = array<i32>} : memref<1x1x14x8xf32, #tpu.memory_space<vmem>>, vector<1x1x14x8xf32>,
    return
  }
  func.func @transform_0(%arg0: i32) -> (i32, i32, i32, i32) {
    %c0_i32 = arith.constant 0 : i32
    %c0_i32_0 = arith.constant 0 : i32
    %c0_i32_1 = arith.constant 0 : i32
    %c0_i32_2 = arith.constant 0 : i32
    return %arg0, %c0_i32, %c0_i32_0, %c0_i32_1 : i32, i32, i32, i32
  }
  func.func @transform_1(%arg0: i32) -> (i32, i32) {
    %c0_i32 = arith.constant 0 : i32
    %c0_i32_0 = arith.constant 0 : i32
    %c0_i32_1 = arith.constant 0 : i32
    return %c0_i32, %c0_i32_0 : i32, i32
  }
  func.func @transform_2(%arg0: i32) -> (i32, i32) {
    %c0_i32 = arith.constant 0 : i32
    %c0_i32_0 = arith.constant 0 : i32
    %c0_i32_1 = arith.constant 0 : i32
    return %c0_i32, %c0_i32_0 : i32, i32
  }
  func.func @transform_3(%arg0: i32) -> (i32, i32) {
    %c0_i32 = arith.constant 0 : i32
    %c0_i32_0 = arith.constant 0 : i32
    %c0_i32_1 = arith.constant 0 : i32
    return %c0_i32, %c0_i32_0 : i32, i32
  }
  func.func @transform_4(%arg0: i32) -> (i32, i32) {
    %c0_i32 = arith.constant 0 : i32
    %c0_i32_0 = arith.constant 0 : i32
    %c0_i32_1 = arith.constant 0 : i32
    return %c0_i32, %c0_i32_0 : i32, i32
  }
  func.func @transform_5(%arg0: i32) -> (i32, i32, i32, i32) {
    %c0_i32 = arith.constant 0 : i32
    %c0_i32_0 = arith.constant 0 : i32
    %c0_i32_1 = arith.constant 0 : i32
    %c0_i32_2 = arith.constant 0 : i32
    return %arg0, %c0_i32, %c0_i32_0, %c0_i32_1 : i32, i32, i32, i32
  }
}

</mosaic_0001>

<bundles_post_ra>
// kernel: tpu_custom_call.1
= control target key start
LH: loop header
LB: loop body
LE: loop exit
PB: predicated region body
PF: predicated region fallthrough
CT: control target
= control target key end

     0   :  { %s703_s18 = smov 0   ;;  %s801_s0 = inlined_call_operand.vmem [shape: f32[2,1,16,8], index: 0, kind: input, shape index: {}]   ;;  %s802_s1 = inlined_call_operand.vmem [shape: f32[24,8], index: 1, kind: input, shape index: {}]   ;;  %s803_s2 = inlined_call_operand.vmem [shape: f32[1,8], index: 2, kind: input, shape index: {}]   ;;  %s804_s3 = inlined_call_operand.vmem [shape: f32[48,8], index: 3, kind: input, shape index: {}]   ;;  %s805_s4 = inlined_call_operand.vmem [shape: f32[1,8], index: 4, kind: input, shape index: {}]   ;;  %s806_s5 = inlined_call_operand.vmem [shape: f32[2,1,14,8], index: 5, kind: output, shape index: {}]  }
   0x1 LB: > { %s575_s19 = sadd.s32 4294967295, %s666_s18   ;;  %p579_p0 = scmp.ge.s32.totalorder %s666_s18, 1  ;;  %s666_s18 = sphi %s703_s18, %s15_s18  }
   0x2   : > { %p187_p1 = scmp.lt.s32.totalorder %s666_s18, 3 }
   0x4   : > { %p188_p2 = pnand %p579_p0, %p187_p1 }
   0x5   : > { %p215_p3 = scmp.lt.s32.totalorder (!%p188_p2), %s575_s19, 1  ;;  %v270_v0 = vld [vmem:[%s802_s1] sm:$0xff] (!%p188_p2)  ;;  %v271_v1 = vld [vmem:[%s802_s1 + $0x8] sm:$0xff] (!%p188_p2)  ;;  %v272_v3 = vld [vmem:[%s802_s1 + $0x10] sm:$0xff] (!%p188_p2)  ;;  %vm229_vm0 = vcmask (!%p188_p2), 1040384   ;;  %vm240_vm1 = vcmask (!%p188_p2), 1046528  }
   0x6   : > { %191 = sbr.rel (%p188_p2) target bundleno = 707 (0x2c3), region = 40  ;;  %v631_v2 = vpack.c.bf16 (!%p188_p2), %v271_v1, %v270_v0  ;;  %vm252_vm2 = vcmask (!%p188_p2), 1045504   ;;  %s668_s30 = smov (!%p188_p2), 8   ;;  %vm264_vm3 = vcmask (!%p188_p2), 64512   ;;  %vm267_vm4 = vcmask (!%p188_p2), 130048   ;;  %v420_v32 = vld [vmem:[%s804_s3] sm:$0xff] (!%p188_p2) }
   0x7   : > { %s669_s6 = smov (!%p188_p2), 16   ;;  %s670_s7 = smov (!%p188_p2), 24   ;;  %vm280_vm5 = vcmask (!%p188_p2), 195584   ;;  %v421_v33 = vld [vmem:[%s804_s3 + $0x8] sm:$0xff] (!%p188_p2)  ;;  %v422_v35 = vld [vmem:[%s804_s3 + $0x10] sm:$0xff] (!%p188_p2)  ;;  %v423_v36 = vld [vmem:[%s804_s3 + $0x18] sm:$0xff] (!%p188_p2) }
   0x8   : > { %632 = vmatprep.subr.bf16.mxu0 (!%p188_p2), %v631_v2  ;;  %s671_s8 = smov (!%p188_p2), 32   ;;  %v635_v34 = vpack.c.bf16 (!%p188_p2), %v421_v33, %v420_v32  ;;  %v639_v37 = vpack.c.bf16 (!%p188_p2), %v423_v36, %v422_v35  ;;  %v584_v38 = vld [vmem:[%s803_s2] ss:$0 sm:$0xff] (!%p188_p2)  ;;  %v425_v40 = vld [vmem:[%s804_s3 + $0x28] sm:$0xff] (!%p188_p2)  ;;  %s672_s25 = smov (!%p188_p2), 40   ;;  %vm414_vm6 = vcmask (!%p188_p2), 261120  }
   0x9   : > { %634 = vmatpush3.bf16.msra.mxu0 (!%p188_p2), %v631_v2  ;;  %v424_v39 = vld [vmem:[%s804_s3 + $0x20] sm:$0xff] (!%p188_p2)  ;;  %vm417_vm7 = vcmask (!%p188_p2), 326656   ;;  %vm433_vm8 = vcmask (!%p188_p2), 392192   ;;  %vm518_vm9 = vcmask (!%p188_p2), 62464  }
   0xa   : > { %611 = vmatprep.subr.mxu0 (!%p188_p2), %v272_v3  ;;  %636 = vmatprep.subr.bf16.mxu1 (!%p188_p2), %v635_v34  ;;  %v643_v42 = vpack.c.bf16 (!%p188_p2), %v425_v40, %v424_v39 }
   0xb   : > { %638 = vmatpush3.bf16.msra.mxu1 (!%p188_p2), %v635_v34 }
   0xc   : > { %640 = vmatprep.subr.bf16.mxu1 (!%p188_p2), %v639_v37 }
   0xd   : > { %s808_s19 = smov (!%p215_p3, %s575_s19), 1  ;;  %612 = vmatpush3.msra.mxu0 %v272_v3 }
   0xe   : > { %s592_s26 = sshll.u32 %s808_s19, 4 }
   0xf   : > { %s219_s29 = scalar_lea.vmem %s801_s0, %s592_s26  ;;  %642 = vmatpush3.bf16.msra.mxu1 %v639_v37 }
  0x10   : > { %v728_v4 = vld [vmem:[%s219_s29] sm:$0xff]  ;;  %v730_v5 = vld [vmem:[%s219_s29 + $0x8] sm:$0xff]  ;;  %644 = vmatprep.subr.bf16.mxu1 %v643_v42 }
  0x11   : > { %v230_v6 = vrot.slane %v728_v4, 7  ;;  %v231_v7 = vrot.slane %v730_v5, 7  ;;  %v391_v29 = vrot.slane %v730_v5, 1  ;;  %v390_v30 = vrot.slane %v728_v4, 1 }
  0x12   : > { %v400_v53 = vrot.slane %v730_v5, 2  ;;  %v399_v54 = vrot.slane %v728_v4, 2 }
  0x13   : > { %v232_v8 = vsel %vm229_vm0, %v230_v6, %v231_v7  ;;  %v236_v9 = vsel %vm229_vm0, 0.0, %v230_v6  ;;  %v237_v10 = vsel %vm229_vm0, %v231_v7, 0.0  ;;  %v392_v31 = vsel %vm240_vm1, %v390_v30, %v391_v29  ;;  %646 = vmatpush3.bf16.msra.mxu1 %v643_v42 }
  0x14   : > { %v241_v11 = vrot.slane %v236_v9, 1  ;;  %v242_v12 = vrot.slane %v232_v8, 1  ;;  %v253_v13 = vrot.slane %v236_v9, 2  ;;  %v254_v14 = vrot.slane %v232_v8, 2 }
  0x15   : > { %v244_v15 = vrot.slane %v237_v10, 1  ;;  %v256_v16 = vrot.slane %v237_v10, 2  ;;  %v401_v56 = vsel %vm252_vm2, %v399_v54, %v400_v53 }
  0x16   : > { %v243_v17 = vsel %vm240_vm1, %v241_v11, %v242_v12  ;;  %v255_v18 = vsel %vm252_vm2, %v253_v13, %v254_v14  ;;  %v587_v13 = vld [vmem:[%s805_s4] ss:$0 sm:$0xff] }
  0x17   : > { %246 = vrot.lane.b32.xlu0 %v243_v17, %s668_s30  ;;  %258 = vrot.lane.b32.xlu1 %v255_v18, %s669_s6  ;;  %v245_v19 = vsel %vm240_vm1, %v242_v12, %v244_v15  ;;  %v257_v20 = vsel %vm252_vm2, %v254_v14, %v256_v16 }
  0x1b   : > { %248 = vrot.lane.b32.xlu0 %v245_v19, %s668_s30  ;;  %260 = vrot.lane.b32.xlu1 %v257_v20, %s669_s6 }
  0x1f   : > { %386 = vrot.lane.b32.xlu1 %v730_v5, %s670_s7  ;;  %384 = vrot.lane.b32.xlu0 %v728_v4, %s670_s7 }
  0x23   : > { %395 = vrot.lane.b32.xlu1 %v391_v29, %s671_s8  ;;  %393 = vrot.lane.b32.xlu0 %v392_v31, %s671_s8 }
  0x89   : > { %v247_v21 = vpop.permute.xlu0 %246  ;;  %v259_v22 = vpop.permute.xlu1 %258 }
  0x8a   : > { %v265_v23 = vsel %vm264_vm3, %v236_v9, %v247_v21 }
  0x8b   : > { %v268_v24 = vsel %vm267_vm4, %v265_v23, %v259_v22 }
  0x8c   : > { %613 = vmatprep.mubr.msk.f32.mxu0 %vm280_vm5, %v268_v24 }
  0x8d   : > { %v249_v25 = vpop.permute.xlu0 %248  ;;  %v261_v26 = vpop.permute.xlu1 %260 }
  0x8e   : > { %v266_v27 = vsel %vm264_vm3, %v232_v8, %v249_v25 }
  0x8f   : > { %v269_v28 = vsel %vm267_vm4, %v266_v27, %v261_v26 }
  0x90   : > { %614 = vmatmul.mubr.msk.f32.vlgmr.msra.gmra.mrb[0].mxu0 %vm280_vm5, %v269_v28 }
  0x91   : > { %v387_v57 = vpop.permute.xlu1 %386  ;;  %v385_v58 = vpop.permute.xlu0 %384 }
  0x95   : > { %v396_v59 = vpop.permute.xlu1 %395  ;;  %v394_v60 = vpop.permute.xlu0 %393 }
 0x163   : > { %v615_v41 = vpop.f32.mrb[0].mxu0 }
 0x164   : > { %v359_v43 = vadd.f32 %v615_v41, %v584_v38  ;;  %v353_v44 = vpop.f32.mrb[1].mxu0 }
 0x165   : > { %v354_v45 = vadd.f32 %v584_v38, %v353_v44 }
 0x166   : > { %v363_v46 = vmax.f32 %v359_v43, 0.0 }
 0x167   : > { %v362_v47 = vmax.f32 %v354_v45, 0.0 }
 0x168   : > { %v367_v48 = vrot.slane %v363_v46, 1  ;;  %v376_v52 = vrot.slane %v363_v46, 2 }
 0x169   : > { %v366_v49 = vrot.slane %v362_v47, 1  ;;  %v375_v50 = vrot.slane %v362_v47, 2 }
 0x16a   : > { %371 = vrot.lane.b32.xlu1 %v367_v48, %s668_s30 }
 0x16b   : > { %v368_v51 = vsel %vm240_vm1, %v366_v49, %v367_v48  ;;  %v377_v55 = vsel %vm252_vm2, %v375_v50, %v376_v52 }
 0x16c   : > { %369 = vrot.lane.b32.xlu0 %v368_v51, %s668_s30 }
 0x16e   : > { %380 = vrot.lane.b32.xlu1 %v376_v52, %s669_s6 }
 0x170   : > { %378 = vrot.lane.b32.xlu0 %v377_v55, %s669_s6  ;;  %s224_s6 = scalar_lea.vmem %s806_s5, %s592_s26 }
 0x172   : > { %404 = vrot.lane.b32.xlu1 %v400_v53, %s672_s25 }
 0x174   : > { %402 = vrot.lane.b32.xlu0 %v401_v56, %s672_s25 }
 0x1dc   : > { %v372_v61 = vpop.permute.xlu1 %371 }
 0x1dd   : > { %v409_v63 = vsel %vm264_vm3, %v363_v46, %v372_v61 }
 0x1de   : > { %v370_v62 = vpop.permute.xlu0 %369 }
 0x1df   : > { %v408_v2 = vsel %vm264_vm3, %v362_v47, %v370_v62 }
 0x1e0   : > { %v381_v0 = vpop.permute.xlu1 %380 }
 0x1e1   : > { %v411_v1 = vsel %vm267_vm4, %v409_v63, %v381_v0 }
 0x1e2   : > { %v413_v3 = vsel %vm280_vm5, %v411_v1, %v387_v57  ;;  %v379_v4 = vpop.permute.xlu0 %378 }
 0x1e3   : > { %v410_v5 = vsel %vm267_vm4, %v408_v2, %v379_v4  ;;  %v416_v7 = vsel %vm414_vm6, %v413_v3, %v396_v59 }
 0x1e4   : > { %v412_v6 = vsel %vm280_vm5, %v410_v5, %v385_v58  ;;  %v405_v8 = vpop.permute.xlu1 %404 }
 0x1e5   : > { %v415_v9 = vsel %vm414_vm6, %v412_v6, %v394_v60  ;;  %v419_v12 = vsel %vm417_vm7, %v416_v7, %v405_v8 }
 0x1e6   : > { %v403_v10 = vpop.permute.xlu0 %402 }
 0x1e7   : > { %v418_v11 = vsel %vm417_vm7, %v415_v9, %v403_v10 }
 0x1e8   : > { %628 = vmatprep.mubr.msk.f32.mxu1 %vm433_vm8, %v418_v11 }
 0x1e9   : > { %629 = vmatmul.mubr.msk.f32.vlgmr.msra.gmra.mrb[0].mxu1 %vm433_vm8, %v419_v12 }
 0x2bc   : > { %v630_v14 = vpop.f32.mrb[0].mxu1 }
 0x2bd   : > { %v512_v15 = vadd.f32 %v630_v14, %v587_v13  ;;  %v506_v16 = vpop.f32.mrb[1].mxu1 }
 0x2be   : > { %v507_v17 = vadd.f32 %v587_v13, %v506_v16 }
 0x2bf   : > { %v516_v18 = vmax.f32 %v512_v15, 0.0 }
 0x2c0   : > { %v515_v19 = vmax.f32 %v507_v17, 0.0 }
 0x2c1   : > { %519 = vst.msk [vmem:[%s224_s6 + $0x8] sm:$0x3f] %vm518_vm9, %v516_v18 }
 0x2c2   : > { %517 = vst.msk [vmem:[%s224_s6] sm:$0xff] %vm264_vm3, %v515_v19 }
 0x2c3 PF: > { %s15_s18 = sadd.s32 1, %s666_s18  }
 0x2c4   : > { %p12_p4 = scmp.ge.s32.totalorder %s15_s18, 4  }
 0x2c6   :  { %14 = sbr.rel (!%p12_p4) target bundleno = 1 (0x1), region = 70 }

</bundles_post_ra>
